<compile_context>
chip_gen: v7x
topology: tpu7x:2x2x1
jax: 0.10.0
libtpu: 0.0.40
codegen_flags: <defaults>
</compile_context>

<pallas_src>
import math

import jax
import jax.numpy as jnp
from jax import lax
from jax.experimental import pallas as pl
from jax.experimental.pallas import tpu as pltpu

# ---- ArcFace constants (mirror the PyTorch module __init__) ----------------
_M = 0.5
_S = 64.0
_COS_M = math.cos(_M)
_SIN_M = math.sin(_M)
_TH = math.cos(math.pi - _M)
_MM = math.sin(math.pi - _M) * _M
_EPS = 1e-12  # F.normalize default eps


def _round_up(a, b):
    return (a + b - 1) // b * b


def _pick_tile(dim, align, cap, floor):
    """Largest tile (multiple of `align`, floor <= t <= cap) minimizing padding."""
    d_min = _round_up(dim, align)
    if d_min <= cap:
        return d_min
    floor = min(max(floor, align), cap)
    best_t, best_padded = None, None
    t = floor
    while t <= cap:
        padded = _round_up(dim, t)
        if (
            best_padded is None
            or padded < best_padded
            or (padded == best_padded and t > best_t)
        ):
            best_t, best_padded = t, padded
        t += align
    return best_t


# ---------------------------------------------------------------------------
# Pre-pass: per-row L2 normalization of x, emitted in bf16 (MXU-ready).
# ---------------------------------------------------------------------------
def _l2norm_rows_kernel(x_ref, o_ref):
    x = x_ref[...].astype(jnp.float32)                       # (TB, E)
    norm = jnp.sqrt(jnp.sum(x * x, axis=-1, keepdims=True))  # (TB, 1)
    inv = 1.0 / jnp.maximum(norm, _EPS)                      # F.normalize eps
    o_ref[...] = (x * inv).astype(o_ref.dtype)


def _normalize_rows_bf16(x, tile_rows):
    rows, emb = x.shape
    return pl.pallas_call(
        _l2norm_rows_kernel,
        out_shape=jax.ShapeDtypeStruct((rows, emb), jnp.bfloat16),
        grid=(rows // tile_rows,),
        in_specs=[pl.BlockSpec((tile_rows, emb), lambda i: (i, 0))],
        out_specs=pl.BlockSpec((tile_rows, emb), lambda i: (i, 0)),
        compiler_params=pltpu.CompilerParams(
            dimension_semantics=("parallel",),
        ),
    )(x)


# ---------------------------------------------------------------------------
# Main kernel.  Grid = (class tiles [outer/slow], batch tiles [inner/fast]).
# ---------------------------------------------------------------------------
def arcface_kernel(flags_ref, xn_ref, w_ref, label_ref, out_ref, wn_ref):
    j = pl.program_id(0)              # class-tile index (outer)
    i = pl.program_id(1)              # batch-tile index (inner)
    nb = pl.num_programs(1)

    # Normalize this W class tile once (first batch step) and cache it in VMEM
    # as bf16.  Because batch is the inner grid axis, the f32 W block is only
    # DMA'd from HBM when j changes -> W is read exactly once overall.
    @pl.when(i == 0)
    def _():
        w = w_ref[...].astype(jnp.float32)                       # (TC, E)
        w_norm = jnp.sqrt(jnp.sum(w * w, axis=-1, keepdims=True))
        wn_ref[...] = (w * (1.0 / jnp.maximum(w_norm, _EPS))).astype(wn_ref.dtype)

    # cosine = x_n @ w_n.T as a contraction over E of both operands (no
    # transpose materialized); bf16 operands, f32 accumulation on the MXU.
    cosine = lax.dot_general(
        xn_ref[...], wn_ref[...],
        dimension_numbers=(((1,), (1,)), ((), ())),
        preferred_element_type=jnp.float32,
    )                                                            # (TB, TC)

    has_label = flags_ref[j * nb + i]

    # Cold path: no label falls inside this (batch, class) tile, so the
    # one-hot blend degenerates to plain cosine -> skip the margin epilogue.
    @pl.when(has_label == 0)
    def _():
        out_ref[...] = (cosine * _S).astype(out_ref.dtype)

    @pl.when(has_label != 0)
    def _():
        label = label_ref[...]                                   # (TB, 1) int32
        # sine clamped from below only: 1 - c^2 <= 1 always.
        sine = jnp.sqrt(jnp.maximum(1.0 - cosine * cosine, 0.0))
        phi = cosine * _COS_M - sine * _SIN_M
        # easy_margin == False path:
        phi = jnp.where(cosine > _TH, phi, cosine - _MM)
        tb, tc = cosine.shape
        class_idx = j * tc + lax.broadcasted_iota(jnp.int32, (tb, tc), 1)
        out_ref[...] = (jnp.where(class_idx == label, phi, cosine) * _S).astype(
            out_ref.dtype
        )


def arcface_forward(x, weight, label, *, tb=None, tc=None):
    """Training-mode ArcFace forward: returns scaled margin logits (B, C)."""
    B, E = x.shape
    C, E2 = weight.shape
    assert E == E2

    # Batch tile: multiple of 16 (bf16 sublane packing); class tile: multiple
    # of 128 (lane-dense output, MXU-friendly).  Picked to minimize padding.
    TB = tb if tb is not None else _pick_tile(B, 16, 256, 64)
    TC = tc if tc is not None else _pick_tile(C, 128, 512, 128)
    Bp = _round_up(B, TB)
    Cp = _round_up(C, TC)
    n_bt = Bp // TB
    n_ct = Cp // TC

    x_p = x if Bp == B else jnp.pad(x, ((0, Bp - B), (0, 0)))
    w_p = weight if Cp == C else jnp.pad(weight, ((0, Cp - C), (0, 0)))
    label2d = label.reshape(-1, 1).astype(jnp.int32)
    label_p = (
        label2d
        if Bp == B
        else jnp.pad(label2d, ((0, Bp - B), (0, 0)), constant_values=-1)
    )

    # tile_has_label[j, i] (flattened): does output tile (batch i, class j)
    # contain any label column?  Pad labels (-1) contribute nothing.
    lbl = label_p[:, 0]
    valid = lbl >= 0
    row_bt = (jnp.arange(Bp, dtype=jnp.int32) // TB).astype(jnp.int32)
    lbl_ct = jnp.where(valid, lbl // TC, 0).astype(jnp.int32)
    flags = (
        jnp.zeros((n_ct * n_bt,), jnp.int32)
        .at[lbl_ct * n_bt + row_bt]
        .max(valid.astype(jnp.int32))
    )

    # Pre-pass: x row normalization hoisted out of the class loop (bf16 out).
    x_n = _normalize_rows_bf16(x_p, TB)

    # VMEM footprint: double-buffered streaming blocks + resident normalized-W
    # scratch + elementwise temporaries, with ~25% headroom.  Capped at 48 MiB
    # so v7x (64 MiB physical) keeps >=16 MiB for Mosaic scratch.
    footprint = (
        2 * (TB * E * 2)          # x_n (bf16), double-buffered
        + 2 * (TC * E * 4)        # W (f32), double-buffered
        + 2 * (TB * 4)            # labels
        + 2 * (TB * TC * 4)       # output tile, double-buffered
        + TC * E * 2              # cached normalized W (bf16)
        + 8 * TB * TC * 4         # epilogue temporaries
    )
    vmem_limit = int(min(48 * 2**20, max(8 * 2**20, footprint * 1.25)))

    grid_spec = pltpu.PrefetchScalarGridSpec(
        num_scalar_prefetch=1,
        grid=(n_ct, n_bt),                                   # class outer, batch inner
        in_specs=[
            pl.BlockSpec((TB, E), lambda j, i, flags: (i, 0)),   # normalized x (bf16)
            pl.BlockSpec((TC, E), lambda j, i, flags: (j, 0)),   # weight class tile
            pl.BlockSpec((TB, 1), lambda j, i, flags: (i, 0)),   # labels
        ],
        out_specs=pl.BlockSpec((TB, TC), lambda j, i, flags: (i, j)),
        scratch_shapes=[pltpu.VMEM((TC, E), jnp.bfloat16)],      # cached normalized W
    )

    out = pl.pallas_call(
        arcface_kernel,
        out_shape=jax.ShapeDtypeStruct((Bp, Cp), jnp.float32),
        grid_spec=grid_spec,
        compiler_params=pltpu.CompilerParams(
            # Class axis "parallel" (megacore splits W across cores, each core
            # reads its half once); batch axis "arbitrary" so the
            # normalize-once scratch guard stays correct.
            dimension_semantics=("parallel", "arbitrary"),
            vmem_limit_bytes=vmem_limit,
        ),
    )(flags, x_n, w_p, label_p)

    return out[:B, :C]


# ---------------------------------------------------------------------------
# Pure-JAX f32 reference (mirrors the PyTorch training-mode forward).
# ---------------------------------------------------------------------------
def arcface_reference(x, weight, label):
    xn = x / jnp.maximum(jnp.linalg.norm(x, axis=1, keepdims=True), _EPS)
    wn = weight / jnp.maximum(jnp.linalg.norm(weight, axis=1, keepdims=True), _EPS)
    cosine = xn @ wn.T
    sine = jnp.sqrt(jnp.clip(1.0 - cosine * cosine, 0.0, 1.0))
    phi = cosine * _COS_M - sine * _SIN_M
    phi = jnp.where(cosine > _TH, phi, cosine - _MM)
    one_hot = jax.nn.one_hot(label, weight.shape[0], dtype=cosine.dtype)
    return (one_hot * phi + (1.0 - one_hot) * cosine) * _S


def xavier_uniform(key, shape):
    # nn.init.xavier_uniform_ for a (num_classes, emb_size) weight:
    fan_out, fan_in = shape
    bound = math.sqrt(6.0 / (fan_in + fan_out))
    return jax.random.uniform(key, shape, jnp.float32, -bound, bound)


if __name__ == "__main__":
    # Small shapes consistent with the module: batch=8, emb_size=32, classes=16
    B, E, C = 8, 32, 16
    key = jax.random.PRNGKey(0)
    kx, kw, kl = jax.random.split(key, 3)

    x = jax.random.normal(kx, (B, E), jnp.float32)
    weight = xavier_uniform(kw, (C, E))
    label = jax.random.randint(kl, (B,), 0, C, jnp.int32)

    out = arcface_forward(x, weight, label)
    out = jax.block_until_ready(out)

    assert out.shape == (B, C) and out.dtype == jnp.float32
    assert bool(jnp.isfinite(out).all())

    # bf16 MXU operands vs the f32 reference: tolerance sized for the *64 scale.
    ref = arcface_reference(x, weight, label)
    max_err = float(jnp.max(jnp.abs(out - ref)))
    assert max_err < 2.0, f"max abs error vs f32 reference too large: {max_err}"

    print("KERNEL_OK")
</pallas_src>

<mosaic_0001>
module attributes {stable_mosaic.version = 11 : i64} {
  func.func @_l2norm_rows_kernel(%arg0: i32, %arg1: memref<16x32xf32, #tpu.memory_space<vmem>>, %arg2: memref<16x32xbf16, #tpu.memory_space<vmem>>) attributes {dimension_semantics = [#tpu.dimension_semantics<parallel>], iteration_bounds = array<i64: 1>, scalar_prefetch = 0 : i64, scratch_operands = 0 : i64, tpu.core_type = #tpu.core_type<tc>, window_params = [{transform_indices = @transform_0, window_bounds = array<i64: 16, 32>}, {transform_indices = @transform_1, window_bounds = array<i64: 16, 32>}]} {
    %c0 = arith.constant 0 : index
    %c0_0 = arith.constant 0 : index
    %0 = vector.load %arg1[%c0, %c0_0] : memref<16x32xf32, #tpu.memory_space<vmem>>, vector<16x32xf32>
    %1 = arith.mulf %0, %0 : vector<16x32xf32>
    %cst = arith.constant dense<0.000000e+00> : vector<16xf32>
    %2 = vector.multi_reduction <add>, %1, %cst [1] : vector<16x32xf32> to vector<16xf32>
    %3 = vector.shape_cast %2 : vector<16xf32> to vector<16x1xf32>
    %4 = math.sqrt %3 : vector<16x1xf32>
    %cst_1 = arith.constant 9.99999996E-13 : f32
    %5 = vector.broadcast %cst_1 : f32 to vector<16x1xf32>
    %6 = arith.maximumf %4, %5 : vector<16x1xf32>
    %cst_2 = arith.constant 1.000000e+00 : f32
    %7 = vector.broadcast %cst_2 : f32 to vector<16x1xf32>
    %8 = arith.divf %7, %6 : vector<16x1xf32>
    %9 = vector.broadcast %8 : vector<16x1xf32> to vector<16x32xf32>
    %10 = arith.mulf %0, %9 : vector<16x32xf32>
    %11 = arith.truncf %10 : vector<16x32xf32> to vector<16x32xbf16>
    %c0_3 = arith.constant 0 : index
    %c0_4 = arith.constant 0 : index
    %12 = vector.load %arg2[%c0_3, %c0_4] : memref<16x32xbf16, #tpu.memory_space<vmem>>, vector<16x32xbf16>
    tpu.vector_store %arg2[%c0_3, %c0_4], %11 {strides = array<i32>} : memref<16x32xbf16, #tpu.memory_space<vmem>>, vector<16x32xbf16>,
    return
  }
  func.func @transform_0(%arg0: i32) -> (i32, i32) {
    %c0_i32 = arith.constant 0 : i32
    %c0_i32_0 = arith.constant 0 : i32
    return %arg0, %c0_i32 : i32, i32
  }
  func.func @transform_1(%arg0: i32) -> (i32, i32) {
    %c0_i32 = arith.constant 0 : i32
    %c0_i32_0 = arith.constant 0 : i32
    return %arg0, %c0_i32 : i32, i32
  }
}

</mosaic_0001>

<bundles_post_ra>
// kernel: tpu_custom_call.1
= control target key start
LH: loop header
LB: loop body
LE: loop exit
PB: predicated region body
PF: predicated region fallthrough
CT: control target
= control target key end

     0   :  { %6 = vsyncpa [#allocation3], 0  ;;  %s190_s0 = inlined_call_operand.hbm [shape: f32[16,32], index: 0, kind: input, shape index: {}]   ;;  %s191_s1 = inlined_call_operand.hbm [shape: bf16[16,32], index: 1, kind: output, shape index: {}]  }
   0x1   :  { %7 = vsyncpa [#allocation4], 0  ;;  %s150_s6 = smov [#allocation2]   ;;  %s102_s10 = scalar_lea.hbm %s190_s0, 256 }
   0x2   :  { %s13_s7 = sshll.u32 %s150_s6, 4  ;;  %p103_p0 = scmp.ne.s32.totalorder %s190_s0, %s102_s10  ;;  %s14_s7 = int_to_ptr.vmem [resolvable:$true] %s13_s7 }
   0x3   :  { %p106_p1 = scmp.lt.u32.totalorder %s102_s10, %s190_s0 }
   0x5   :  { %p108_p2 = pnand %p106_p1, %p103_p0 }
   0x7   :  { %111 = shalt.err (!%p108_p2)
}
   0x8   :  { %s112_s15 = scalar_lea.vmem %s14_s7, 256  ;;  %p117_p4 = scmp.lt.s32.totalorder %s14_s7, %s14_s7 }
   0x9   :  { %p113_p3 = scmp.ne.s32.totalorder %s14_s7, %s112_s15  ;;  %p118_p5 = scmp.lt.s32.totalorder %s112_s15, %s112_s15 }
   0xb   :  { %p119_p6 = por %p118_p5, %p117_p4 }
   0xd   :  { %p120_p7 = pnand %p119_p6, %p113_p3 }
   0xf   :  { %123 = shalt.err (!%p120_p7)
}
  0x10   :  { %s151_s16 = smov 128   ;;  %s152_s17 = smov 8  }
  0x11   :  { %19 = dma.hbm_to_vmem [thread:$0]  %s190_s0, 256, %s14_s7, [#allocation3], %s151_s16, %s151_s16, %s152_s17  }
  0x12   :  { %146 = dma.done.wait [#allocation3], 256  }
  0x13   :  { %147 = vsyncadd [#allocation3], 4294967040  ;;  %v23_v0 = vld [vmem:[#allocation2] sm:$0xff]  ;;  %vm27_vm0 = vcmask 261120   ;;  %v24_v1 = vld [vmem:[#allocation2 + $0x8] sm:$0xff]  ;;  %vm64_vm5 = vcmask 257024  }
  0x14   :  { %v25_v2 = vmul.f32 %v23_v0, %v23_v0  ;;  %v26_v3 = vmul.f32 %v24_v1, %v24_v1  ;;  %s153_s0 = smov [#allocation5]  }
  0x15   :  { %s72_s20 = sshll.u32 %s153_s0, 4  ;;  %s73_s20 = int_to_ptr.vmem [resolvable:$true] %s72_s20 }
  0x16   :  { %v28_v4 = vsel %vm27_vm0, %v25_v2, 0.0  ;;  %v31_v5 = vsel %vm27_vm0, %v26_v3, 0.0  ;;  %s124_s21 = scalar_lea.vmem %s73_s20, 128  ;;  %p129_p9 = scmp.lt.s32.totalorder %s73_s20, %s73_s20 }
  0x17   :  { %29 = vadd.xlane.f32.xlu0 %v28_v4  ;;  %p125_p8 = scmp.ne.s32.totalorder %s73_s20, %s124_s21  ;;  %p130_p10 = scmp.lt.s32.totalorder %s124_s21, %s124_s21 }
  0x19   :  { %p131_p11 = por %p130_p10, %p129_p9 }
  0x1b   :  { %32 = vadd.xlane.f32.xlu0 %v31_v5  ;;  %p132_p12 = pnand %p131_p11, %p125_p8 }
  0xa4   :  { %v30_v6 = vpop.xlane.xlu0 %29 }
  0xa5   :  { %94 = vrsqrt.f32 %v30_v6  ;;  %vm36_vm1 = vcmp.eq.f32.partialorder %v30_v6, inf  ;;  %v39_v10 = vand.u32 2147483648, %v30_v6  ;;  %vm38_vm2 = vcmp.eq.f32.partialorder %v30_v6, 0.0 }
  0xa8   :  { %v33_v7 = vpop.xlane.xlu0 %32 }
  0xa9   :  { %96 = vrsqrt.f32 %v33_v7  ;;  %vm43_vm3 = vcmp.eq.f32.partialorder %v33_v7, inf  ;;  %v46_v16 = vand.u32 2147483648, %v33_v7  ;;  %vm45_vm4 = vcmp.eq.f32.partialorder %v33_v7, 0.0 }
  0xaf   :  { %v95_v8 = vpop.eup %94 }
  0xb0   :  { %v35_v9 = vmul.f32 %v95_v8, %v30_v6 }
  0xb2   :  { %v37_v11 = vsel %vm36_vm1, %v30_v6, %v35_v9 }
  0xb3   :  { %v97_v12 = vpop.eup %96  ;;  %v40_v13 = vsel %vm38_vm2, %v39_v10, %v37_v11 }
  0xb4   :  { %v48_v14 = vmax.f32 %v40_v13, 1e-12  ;;  %v42_v15 = vmul.f32 %v97_v12, %v33_v7 }
  0xb6   :  { %98 = vrcp.f32 %v48_v14  ;;  %v44_v17 = vsel %vm43_vm3, %v33_v7, %v42_v15 }
  0xb7   :  { %v47_v18 = vsel %vm45_vm4, %v46_v16, %v44_v17 }
  0xb8   :  { %v49_v19 = vmax.f32 %v47_v18, 1e-12 }
  0xba   :  { %100 = vrcp.f32 %v49_v19 }
  0xc0   :  { %v99_v20 = vpop.eup %98 }
  0xc1   :  { %v54_v21 = vmul.f32 %v99_v20, %v23_v0 }
  0xc3   :  { %v86_v22 = vpack.c.bf16 %v54_v21, %v54_v21 }
  0xc4   :  { %v101_v23 = vpop.eup %100 }
  0xc5   :  { %v55_v24 = vmul.f32 %v101_v23, %v24_v1  ;;  %65 = vst.msk [vmem:[#allocation5] sm:$0xf] %vm64_vm5, %v86_v22 }
  0xc7   :  { %v87_v25 = vpack.c.bf16 %v55_v24, %v55_v24 }
  0xc9   :  { %66 = vst.msk [vmem:[#allocation5 + $0x4] sm:$0xf] %vm64_vm5, %v87_v25 }
  0xca   :  { %135 = shalt.err (!%p132_p12)
}
  0xcb   :  { %s136_s24 = scalar_lea.hbm %s191_s1, 128 }
  0xcc   :  { %p137_p13 = scmp.ne.s32.totalorder %s191_s1, %s136_s24  ;;  %p140_p0 = scmp.lt.u32.totalorder %s136_s24, %s191_s1 }
  0xce   :  { %p142_p1 = pnand %p140_p0, %p137_p13 }
  0xd0   :  { %145 = shalt.err (!%p142_p1)
}
  0xd1   :  { %s154_s29 = smov 64   ;;  %s155_s30 = smov 4  }
  0xd2   :  { %78 = dma.vmem_to_hbm [thread:$0]  %s73_s20, 128, %s191_s1, [#allocation4], %s154_s29, %s154_s29, %s155_s30  }
  0xd3   :  { %148 = dma.done.wait [#allocation4], 128  }
  0xd4   :  { %149 = vsyncadd [#allocation4], 4294967168 }
  0xd5   :  { %82 = vsyncpa [#allocation3], 1 }
  0xd6   :  { %83 = vsyncpa [#allocation4], 1 }

</bundles_post_ra>
